<compile_context>
chip_gen: v5e
topology: v5e:2x2
jax: 0.10.0
libtpu: 0.0.40
codegen_flags: <defaults>
</compile_context>

<pallas_src>
import math

import jax
import jax.numpy as jnp
import numpy as np
from jax.experimental import pallas as pl

# ---- static model hyper-parameters (small, deterministic) ----
S = 8          # num_elements (sequence length)
B = 2          # batch size
E = 32         # d_model
NHEAD = 4
DH = E // NHEAD
FF = 64        # dim_feedforward
EPS = 1e-5     # nn.LayerNorm default
N = S * B      # flattened (seq * batch) rows, batch index is the minor factor

# rows of the packed bias / layernorm parameter slab (width FF; params live in lanes [0:E]
# except linear1's bias which uses the full FF lanes)
ROW_BQ, ROW_BK, ROW_BV = 0, 1, 2
ROW_OB, ROW_B2 = 3, 4
ROW_G1, ROW_BE1, ROW_G2, ROW_BE2 = 5, 6, 7, 8
ROW_B1 = 9
SLAB_ROWS = 16  # padded to a sublane multiple


def _layer_norm(x, gamma, beta):
    mu = jnp.mean(x, axis=-1, keepdims=True)
    var = jnp.mean((x - mu) ** 2, axis=-1, keepdims=True)
    return (x - mu) * jax.lax.rsqrt(var + EPS) * gamma + beta


def encoder_layer_kernel(src_ref, pos_ref, wqkv_ref, wout_ref, w1_ref, w2_ref,
                         pv_ref, out_ref, attn_ref):
    x = src_ref[...]                       # (N, E), rows ordered (s, b) with b minor
    qk = x + pos_ref[...]                  # q = k = src + pos

    # ---- fused q/k/v projection: one (2N, E) @ (E, 3E) MXU pass ----
    stacked = jnp.concatenate([qk, x], axis=0)                                  # (2N, E)
    proj = jnp.dot(stacked, wqkv_ref[...], preferred_element_type=jnp.float32)  # (2N, 3E)

    q = proj[0:N, 0:E] + pv_ref[ROW_BQ:ROW_BQ + 1, 0:E]
    k = proj[0:N, E:2 * E] + pv_ref[ROW_BK:ROW_BK + 1, 0:E]
    v = proj[N:2 * N, 2 * E:3 * E] + pv_ref[ROW_BV:ROW_BV + 1, 0:E]

    # ---- head-batched attention over the flattened (seq*batch) row axis ----
    scale = 1.0 / math.sqrt(DH)
    qh = jnp.stack([q[:, h * DH:(h + 1) * DH] for h in range(NHEAD)], axis=0) * scale
    kh = jnp.stack([k[:, h * DH:(h + 1) * DH] for h in range(NHEAD)], axis=0)
    vh = jnp.stack([v[:, h * DH:(h + 1) * DH] for h in range(NHEAD)], axis=0)   # (H, N, DH)

    # row s*B+b may only attend to rows with the same batch index b
    rows = jax.lax.broadcasted_iota(jnp.int32, (N, N), 0)
    cols = jax.lax.broadcasted_iota(jnp.int32, (N, N), 1)
    mask_bias = jnp.where((rows % B) == (cols % B), 0.0, -1e30).astype(jnp.float32)

    s = jnp.einsum('hqd,hkd->hqk', qh, kh, preferred_element_type=jnp.float32)  # (H, N, N)
    s = s + mask_bias
    s = s - jnp.max(s, axis=-1, keepdims=True)
    p = jnp.exp(s)
    p = p * pl.reciprocal(jnp.sum(p, axis=-1, keepdims=True), approx=False)

    # head-averaged attention weights (cross-batch entries are exactly 0 thanks to the mask)
    attn_ref[...] = jnp.mean(p, axis=0)                                         # (N, N)

    o = jnp.einsum('hqk,hkd->hqd', p, vh, preferred_element_type=jnp.float32)   # (H, N, DH)
    attn_cat = jnp.concatenate([o[h] for h in range(NHEAD)], axis=-1)           # (N, E)

    attn_out = (jnp.dot(attn_cat, wout_ref[...], preferred_element_type=jnp.float32)
                + pv_ref[ROW_OB:ROW_OB + 1, 0:E])

    # ---- residual + norm1 ----
    h1 = _layer_norm(x + attn_out,
                     pv_ref[ROW_G1:ROW_G1 + 1, 0:E], pv_ref[ROW_BE1:ROW_BE1 + 1, 0:E])

    # ---- feed-forward: linear1 -> relu -> linear2 ----
    ff = (jnp.dot(h1, w1_ref[...], preferred_element_type=jnp.float32)
          + pv_ref[ROW_B1:ROW_B1 + 1, 0:FF])
    ff = jnp.maximum(ff, 0.0)
    ff = (jnp.dot(ff, w2_ref[...], preferred_element_type=jnp.float32)
          + pv_ref[ROW_B2:ROW_B2 + 1, 0:E])

    # ---- residual + norm2 ----
    out_ref[...] = _layer_norm(h1 + ff,
                               pv_ref[ROW_G2:ROW_G2 + 1, 0:E], pv_ref[ROW_BE2:ROW_BE2 + 1, 0:E])


def _pack_params(params):
    """Pre-transpose weights and pack the 10 small bias/norm vectors into one slab."""
    (ipw, ipb, ow, ob, w1, b1, w2, b2, g1, be1, g2, be2) = params
    wqkv_t = ipw.T          # (E, 3E)
    wout_t = ow.T           # (E, E)
    w1_t = w1.T             # (E, FF)
    w2_t = w2.T             # (FF, E)
    slab = jnp.zeros((SLAB_ROWS, FF), jnp.float32)
    slab = slab.at[ROW_BQ, 0:E].set(ipb[0, 0:E])
    slab = slab.at[ROW_BK, 0:E].set(ipb[0, E:2 * E])
    slab = slab.at[ROW_BV, 0:E].set(ipb[0, 2 * E:3 * E])
    slab = slab.at[ROW_OB, 0:E].set(ob[0])
    slab = slab.at[ROW_B2, 0:E].set(b2[0])
    slab = slab.at[ROW_G1, 0:E].set(g1[0])
    slab = slab.at[ROW_BE1, 0:E].set(be1[0])
    slab = slab.at[ROW_G2, 0:E].set(g2[0])
    slab = slab.at[ROW_BE2, 0:E].set(be2[0])
    slab = slab.at[ROW_B1, 0:FF].set(b1[0])
    return wqkv_t, wout_t, w1_t, w2_t, slab


@jax.jit
def transformer_encoder_layer(src, pos, params):
    """src, pos: [S, B, E] float32. Returns (out [S, B, E], attn_weights [B, S, S])."""
    # row-major reshape (no data movement): rows are (s, b) with b minor
    src_flat = src.reshape(N, E)
    pos_flat = pos.reshape(N, E)
    wqkv_t, wout_t, w1_t, w2_t, slab = _pack_params(params)

    # Single invocation, no grid: every operand/output is a full VMEM-resident block
    # (total working set < 64 KiB, thousands of times smaller than VMEM on any TPU gen).
    out_flat, attn_full = pl.pallas_call(
        encoder_layer_kernel,
        out_shape=[
            jax.ShapeDtypeStruct((N, E), jnp.float32),
            jax.ShapeDtypeStruct((N, N), jnp.float32),
        ],
    )(src_flat, pos_flat, wqkv_t, wout_t, w1_t, w2_t, slab)

    out = out_flat.reshape(S, B, E)
    # per-batch rows/cols live at stride B in the flattened attention matrix
    attn = jnp.stack([attn_full[b::B, b::B] for b in range(B)], axis=0)   # (B, S, S)
    return out, attn


def reference(src, pos, params):
    """Pure-JAX reference of forward_post (eval mode) for validation."""
    (ipw, ipb, ow, ob, w1, b1, w2, b2, g1, be1, g2, be2) = params
    x = jnp.transpose(src, (1, 0, 2))       # [B, S, E]
    p = jnp.transpose(pos, (1, 0, 2))
    qk = x + p
    wq, wk, wv = ipw[:E], ipw[E:2 * E], ipw[2 * E:]
    bq, bk, bv = ipb[0, :E], ipb[0, E:2 * E], ipb[0, 2 * E:]
    q = qk @ wq.T + bq
    k = qk @ wk.T + bk
    v = x @ wv.T + bv
    qh = q.reshape(B, S, NHEAD, DH).transpose(0, 2, 1, 3)
    kh = k.reshape(B, S, NHEAD, DH).transpose(0, 2, 1, 3)
    vh = v.reshape(B, S, NHEAD, DH).transpose(0, 2, 1, 3)
    scores = jnp.einsum('bhqd,bhkd->bhqk', qh, kh) / math.sqrt(DH)
    pw = jax.nn.softmax(scores, axis=-1)
    ao = jnp.einsum('bhqk,bhkd->bhqd', pw, vh).transpose(0, 2, 1, 3).reshape(B, S, E)
    ao = ao @ ow.T + ob[0]
    h1 = _layer_norm(x + ao, g1[0], be1[0])
    ff = jnp.maximum(h1 @ w1.T + b1[0], 0.0) @ w2.T + b2[0]
    out = _layer_norm(h1 + ff, g2[0], be2[0])
    return jnp.transpose(out, (1, 0, 2)), jnp.mean(pw, axis=1)


if __name__ == "__main__":
    key = jax.random.PRNGKey(0)
    ks = jax.random.split(key, 12)

    src = jax.random.normal(ks[0], (S, B, E), jnp.float32)
    pos = jax.random.normal(ks[1], (S, B, E), jnp.float32) * 0.1

    def init(k, shape, fan_in):
        bound = 1.0 / math.sqrt(fan_in)
        return jax.random.uniform(k, shape, jnp.float32, -bound, bound)

    params = (
        init(ks[2], (3 * E, E), E),      # in_proj_weight
        init(ks[3], (1, 3 * E), E),      # in_proj_bias
        init(ks[4], (E, E), E),          # out_proj.weight
        init(ks[5], (1, E), E),          # out_proj.bias
        init(ks[6], (FF, E), E),         # linear1.weight
        init(ks[7], (1, FF), E),         # linear1.bias
        init(ks[8], (E, FF), FF),        # linear2.weight
        init(ks[9], (1, E), FF),         # linear2.bias
        jnp.ones((1, E), jnp.float32),   # norm1.weight
        jnp.zeros((1, E), jnp.float32),  # norm1.bias
        jnp.ones((1, E), jnp.float32),   # norm2.weight
        jnp.zeros((1, E), jnp.float32),  # norm2.bias
    )

    out, attn = jax.block_until_ready(transformer_encoder_layer(src, pos, params))

    ref_out, ref_attn = reference(src, pos, params)
    np.testing.assert_allclose(np.asarray(out), np.asarray(ref_out), rtol=1e-4, atol=1e-4)
    np.testing.assert_allclose(np.asarray(attn), np.asarray(ref_attn), rtol=1e-4, atol=1e-4)

    print("KERNEL_OK")
</pallas_src>

<mosaic_0001>
module attributes {stable_mosaic.version = 11 : i64} {
  func.func @encoder_layer_kernel(%arg0: memref<16x32xf32, #tpu.memory_space<vmem>>, %arg1: memref<16x32xf32, #tpu.memory_space<vmem>>, %arg2: memref<32x96xf32, #tpu.memory_space<vmem>>, %arg3: memref<32x32xf32, #tpu.memory_space<vmem>>, %arg4: memref<32x64xf32, #tpu.memory_space<vmem>>, %arg5: memref<64x32xf32, #tpu.memory_space<vmem>>, %arg6: memref<16x64xf32, #tpu.memory_space<vmem>>, %arg7: memref<16x32xf32, #tpu.memory_space<vmem>>, %arg8: memref<16x16xf32, #tpu.memory_space<vmem>>) attributes {dimension_semantics = [], scalar_prefetch = 0 : i64, scratch_operands = 0 : i64, tpu.core_type = #tpu.core_type<tc>} {
    %c0 = arith.constant 0 : index
    %c0_0 = arith.constant 0 : index
    %0 = vector.load %arg0[%c0, %c0_0] : memref<16x32xf32, #tpu.memory_space<vmem>>, vector<16x32xf32>
    %c0_1 = arith.constant 0 : index
    %c0_2 = arith.constant 0 : index
    %1 = vector.load %arg1[%c0_1, %c0_2] : memref<16x32xf32, #tpu.memory_space<vmem>>, vector<16x32xf32>
    %2 = arith.addf %0, %1 : vector<16x32xf32>
    %3 = tpu.concatenate %2, %0 in 0 : vector<16x32xf32>, vector<16x32xf32> -> vector<32x32xf32>
    %c0_3 = arith.constant 0 : index
    %c0_4 = arith.constant 0 : index
    %4 = vector.load %arg2[%c0_3, %c0_4] : memref<32x96xf32, #tpu.memory_space<vmem>>, vector<32x96xf32>
    %cst = arith.constant dense<0.000000e+00> : vector<32x96xf32>
    %5 = tpu.matmul %3, %4, %cst {dimension_numbers = #tpu.dot_dimension_numbers<[1], [0], [0], [1], [0, 0, 1, 1], [], []>} : vector<32x32xf32>, vector<32x96xf32>, vector<32x96xf32> -> vector<32x96xf32>
    %6 = vector.extract_strided_slice %5 {offsets = [0, 0], sizes = [16, 32], strides = [1, 1]} : vector<32x96xf32> to vector<16x32xf32>
    %c0_5 = arith.constant 0 : index
    %c0_6 = arith.constant 0 : index
    %7 = vector.load %arg6[%c0_5, %c0_6] : memref<16x64xf32, #tpu.memory_space<vmem>>, vector<1x32xf32>
    %8 = vector.broadcast %7 : vector<1x32xf32> to vector<16x32xf32>
    %9 = arith.addf %6, %8 : vector<16x32xf32>
    %10 = vector.extract_strided_slice %5 {offsets = [0, 32], sizes = [16, 32], strides = [1, 1]} : vector<32x96xf32> to vector<16x32xf32>
    %c1 = arith.constant 1 : index
    %c0_7 = arith.constant 0 : index
    %11 = vector.load %arg6[%c1, %c0_7] : memref<16x64xf32, #tpu.memory_space<vmem>>, vector<1x32xf32>
    %12 = vector.broadcast %11 : vector<1x32xf32> to vector<16x32xf32>
    %13 = arith.addf %10, %12 : vector<16x32xf32>
    %14 = vector.extract_strided_slice %5 {offsets = [16, 64], sizes = [16, 32], strides = [1, 1]} : vector<32x96xf32> to vector<16x32xf32>
    %c2 = arith.constant 2 : index
    %c0_8 = arith.constant 0 : index
    %15 = vector.load %arg6[%c2, %c0_8] : memref<16x64xf32, #tpu.memory_space<vmem>>, vector<1x32xf32>
    %16 = vector.broadcast %15 : vector<1x32xf32> to vector<16x32xf32>
    %17 = arith.addf %14, %16 : vector<16x32xf32>
    %18 = vector.extract_strided_slice %9 {offsets = [0, 0], sizes = [16, 8], strides = [1, 1]} : vector<16x32xf32> to vector<16x8xf32>
    %19 = vector.extract_strided_slice %9 {offsets = [0, 8], sizes = [16, 8], strides = [1, 1]} : vector<16x32xf32> to vector<16x8xf32>
    %20 = vector.extract_strided_slice %9 {offsets = [0, 16], sizes = [16, 8], strides = [1, 1]} : vector<16x32xf32> to vector<16x8xf32>
    %21 = vector.extract_strided_slice %9 {offsets = [0, 24], sizes = [16, 8], strides = [1, 1]} : vector<16x32xf32> to vector<16x8xf32>
    %22 = vector.shape_cast %18 : vector<16x8xf32> to vector<1x16x8xf32>
    %23 = vector.shape_cast %19 : vector<16x8xf32> to vector<1x16x8xf32>
    %24 = vector.shape_cast %20 : vector<16x8xf32> to vector<1x16x8xf32>
    %25 = vector.shape_cast %21 : vector<16x8xf32> to vector<1x16x8xf32>
    %26 = tpu.concatenate %22, %23, %24, %25 in 0 : vector<1x16x8xf32>, vector<1x16x8xf32>, vector<1x16x8xf32>, vector<1x16x8xf32> -> vector<4x16x8xf32>
    %cst_9 = arith.constant 0.353553385 : f32
    %27 = vector.broadcast %cst_9 : f32 to vector<4x16x8xf32>
    %28 = arith.mulf %26, %27 : vector<4x16x8xf32>
    %29 = vector.extract_strided_slice %13 {offsets = [0, 0], sizes = [16, 8], strides = [1, 1]} : vector<16x32xf32> to vector<16x8xf32>
    %30 = vector.extract_strided_slice %13 {offsets = [0, 8], sizes = [16, 8], strides = [1, 1]} : vector<16x32xf32> to vector<16x8xf32>
    %31 = vector.extract_strided_slice %13 {offsets = [0, 16], sizes = [16, 8], strides = [1, 1]} : vector<16x32xf32> to vector<16x8xf32>
    %32 = vector.extract_strided_slice %13 {offsets = [0, 24], sizes = [16, 8], strides = [1, 1]} : vector<16x32xf32> to vector<16x8xf32>
    %33 = vector.shape_cast %29 : vector<16x8xf32> to vector<1x16x8xf32>
    %34 = vector.shape_cast %30 : vector<16x8xf32> to vector<1x16x8xf32>
    %35 = vector.shape_cast %31 : vector<16x8xf32> to vector<1x16x8xf32>
    %36 = vector.shape_cast %32 : vector<16x8xf32> to vector<1x16x8xf32>
    %37 = tpu.concatenate %33, %34, %35, %36 in 0 : vector<1x16x8xf32>, vector<1x16x8xf32>, vector<1x16x8xf32>, vector<1x16x8xf32> -> vector<4x16x8xf32>
    %38 = vector.extract_strided_slice %17 {offsets = [0, 0], sizes = [16, 8], strides = [1, 1]} : vector<16x32xf32> to vector<16x8xf32>
    %39 = vector.extract_strided_slice %17 {offsets = [0, 8], sizes = [16, 8], strides = [1, 1]} : vector<16x32xf32> to vector<16x8xf32>
    %40 = vector.extract_strided_slice %17 {offsets = [0, 16], sizes = [16, 8], strides = [1, 1]} : vector<16x32xf32> to vector<16x8xf32>
    %41 = vector.extract_strided_slice %17 {offsets = [0, 24], sizes = [16, 8], strides = [1, 1]} : vector<16x32xf32> to vector<16x8xf32>
    %42 = vector.shape_cast %38 : vector<16x8xf32> to vector<1x16x8xf32>
    %43 = vector.shape_cast %39 : vector<16x8xf32> to vector<1x16x8xf32>
    %44 = vector.shape_cast %40 : vector<16x8xf32> to vector<1x16x8xf32>
    %45 = vector.shape_cast %41 : vector<16x8xf32> to vector<1x16x8xf32>
    %46 = tpu.concatenate %42, %43, %44, %45 in 0 : vector<1x16x8xf32>, vector<1x16x8xf32>, vector<1x16x8xf32>, vector<1x16x8xf32> -> vector<4x16x8xf32>
    %47 = tpu.iota {dimensions = array<i32: 0>} : vector<16x16xi32>
    %48 = tpu.iota {dimensions = array<i32: 1>} : vector<16x16xi32>
    %c2_i32 = arith.constant 2 : i32
    %c0_i32 = arith.constant 0 : i32
    %49 = arith.cmpi eq, %c2_i32, %c0_i32 : i32
    %c1_i32 = arith.constant 1 : i32
    %50 = arith.select %49, %c1_i32, %c2_i32 : i32
    %51 = vector.broadcast %50 : i32 to vector<16x16xi32>
    %52 = arith.remsi %47, %51 : vector<16x16xi32>
    %c0_i32_10 = arith.constant 0 : i32
    %53 = vector.broadcast %c0_i32_10 : i32 to vector<16x16xi32>
    %54 = arith.cmpi ne, %52, %53 : vector<16x16xi32>
    %c0_i32_11 = arith.constant 0 : i32
    %55 = vector.broadcast %c0_i32_11 : i32 to vector<16x16xi32>
    %56 = arith.cmpi slt, %52, %55 : vector<16x16xi32>
    %c0_i32_12 = arith.constant 0 : i32
    %57 = arith.cmpi slt, %50, %c0_i32_12 : i32
    %58 = vector.broadcast %57 : i1 to vector<16x16xi1>
    %59 = vector.broadcast %58 : vector<16x16xi1> to vector<16x16xi1>
    %60 = arith.xori %56, %59 : vector<16x16xi1>
    %61 = arith.andi %60, %54 : vector<16x16xi1>
    %62 = vector.broadcast %50 : i32 to vector<16x16xi32>
    %63 = arith.addi %52, %62 : vector<16x16xi32>
    %64 = arith.select %61, %63, %52 : vector<16x16xi1>, vector<16x16xi32>
    %c2_i32_13 = arith.constant 2 : i32
    %c0_i32_14 = arith.constant 0 : i32
    %65 = arith.cmpi eq, %c2_i32_13, %c0_i32_14 : i32
    %c1_i32_15 = arith.constant 1 : i32
    %66 = arith.select %65, %c1_i32_15, %c2_i32_13 : i32
    %67 = vector.broadcast %66 : i32 to vector<16x16xi32>
    %68 = arith.remsi %48, %67 : vector<16x16xi32>
    %c0_i32_16 = arith.constant 0 : i32
    %69 = vector.broadcast %c0_i32_16 : i32 to vector<16x16xi32>
    %70 = arith.cmpi ne, %68, %69 : vector<16x16xi32>
    %c0_i32_17 = arith.constant 0 : i32
    %71 = vector.broadcast %c0_i32_17 : i32 to vector<16x16xi32>
    %72 = arith.cmpi slt, %68, %71 : vector<16x16xi32>
    %c0_i32_18 = arith.constant 0 : i32
    %73 = arith.cmpi slt, %66, %c0_i32_18 : i32
    %74 = vector.broadcast %73 : i1 to vector<16x16xi1>
    %75 = vector.broadcast %74 : vector<16x16xi1> to vector<16x16xi1>
    %76 = arith.xori %72, %75 : vector<16x16xi1>
    %77 = arith.andi %76, %70 : vector<16x16xi1>
    %78 = vector.broadcast %66 : i32 to vector<16x16xi32>
    %79 = arith.addi %68, %78 : vector<16x16xi32>
    %80 = arith.select %77, %79, %68 : vector<16x16xi1>, vector<16x16xi32>
    %81 = arith.cmpi eq, %64, %80 : vector<16x16xi32>
    %cst_19 = arith.constant 0.000000e+00 : f32
    %cst_20 = arith.constant -1.000000e+30 : f32
    %82 = vector.broadcast %cst_19 : f32 to vector<16x16xf32>
    %83 = vector.broadcast %cst_20 : f32 to vector<16x16xf32>
    %84 = arith.select %81, %82, %83 : vector<16x16xi1>, vector<16x16xf32>
    "tpu.trace_start"() <{level = 10 : i32, message = "hqd,hkd->hqk"}> : () -> ()
    %cst_21 = arith.constant dense<0.000000e+00> : vector<4x16x16xf32>
    %85 = tpu.matmul %28, %37, %cst_21 {dimension_numbers = #tpu.dot_dimension_numbers<[2], [2], [1], [1], [0, 0, 0, 1, 1, 1], [0], [0]>} : vector<4x16x8xf32>, vector<4x16x8xf32>, vector<4x16x16xf32> -> vector<4x16x16xf32>
    "tpu.trace_stop"() : () -> ()
    %86 = vector.shape_cast %84 : vector<16x16xf32> to vector<1x16x16xf32>
    %87 = vector.broadcast %86 : vector<1x16x16xf32> to vector<4x16x16xf32>
    %88 = arith.addf %85, %87 : vector<4x16x16xf32>
    %cst_22 = arith.constant dense<0xFF800000> : vector<4x16xf32>
    %89 = vector.multi_reduction <maximumf>, %88, %cst_22 [2] : vector<4x16x16xf32> to vector<4x16xf32>
    %90 = vector.shape_cast %89 : vector<4x16xf32> to vector<4x16x1xf32>
    %91 = vector.broadcast %90 : vector<4x16x1xf32> to vector<4x16x16xf32>
    %92 = arith.subf %88, %91 : vector<4x16x16xf32>
    %93 = math.exp %92 : vector<4x16x16xf32>
    %cst_23 = arith.constant dense<0.000000e+00> : vector<4x16xf32>
    %94 = vector.multi_reduction <add>, %93, %cst_23 [2] : vector<4x16x16xf32> to vector<4x16xf32>
    %95 = vector.shape_cast %94 : vector<4x16xf32> to vector<4x16x1xf32>
    %96 = tpu.reciprocal %95 : vector<4x16x1xf32> -> vector<4x16x1xf32>
    %97 = vector.broadcast %96 : vector<4x16x1xf32> to vector<4x16x16xf32>
    %98 = arith.mulf %93, %97 : vector<4x16x16xf32>
    %cst_24 = arith.constant dense<0.000000e+00> : vector<16x16xf32>
    %99 = vector.multi_reduction <add>, %98, %cst_24 [0] : vector<4x16x16xf32> to vector<16x16xf32>
    %cst_25 = arith.constant 4.000000e+00 : f32
    %100 = vector.broadcast %cst_25 : f32 to vector<16x16xf32>
    %101 = arith.divf %99, %100 : vector<16x16xf32>
    %c0_26 = arith.constant 0 : index
    %c0_27 = arith.constant 0 : index
    %102 = vector.load %arg8[%c0_26, %c0_27] : memref<16x16xf32, #tpu.memory_space<vmem>>, vector<16x16xf32>
    tpu.vector_store %arg8[%c0_26, %c0_27], %101 {strides = array<i32>} : memref<16x16xf32, #tpu.memory_space<vmem>>, vector<16x16xf32>,
    "tpu.trace_start"() <{level = 10 : i32, message = "hqk,hkd->hqd"}> : () -> ()
    %cst_28 = arith.constant dense<0.000000e+00> : vector<4x16x8xf32>
    %103 = tpu.matmul %98, %46, %cst_28 {dimension_numbers = #tpu.dot_dimension_numbers<[2], [1], [1], [2], [0, 0, 0, 1, 1, 2], [0], [0]>} : vector<4x16x16xf32>, vector<4x16x8xf32>, vector<4x16x8xf32> -> vector<4x16x8xf32>
    "tpu.trace_stop"() : () -> ()
    %104 = vector.extract_strided_slice %103 {offsets = [0, 0, 0], sizes = [1, 16, 8], strides = [1, 1, 1]} : vector<4x16x8xf32> to vector<1x16x8xf32>
    %105 = vector.shape_cast %104 : vector<1x16x8xf32> to vector<16x8xf32>
    %106 = vector.extract_strided_slice %103 {offsets = [1, 0, 0], sizes = [1, 16, 8], strides = [1, 1, 1]} : vector<4x16x8xf32> to vector<1x16x8xf32>
    %107 = vector.shape_cast %106 : vector<1x16x8xf32> to vector<16x8xf32>
    %108 = vector.extract_strided_slice %103 {offsets = [2, 0, 0], sizes = [1, 16, 8], strides = [1, 1, 1]} : vector<4x16x8xf32> to vector<1x16x8xf32>
    %109 = vector.shape_cast %108 : vector<1x16x8xf32> to vector<16x8xf32>
    %110 = vector.extract_strided_slice %103 {offsets = [3, 0, 0], sizes = [1, 16, 8], strides = [1, 1, 1]} : vector<4x16x8xf32> to vector<1x16x8xf32>
    %111 = vector.shape_cast %110 : vector<1x16x8xf32> to vector<16x8xf32>
    %112 = tpu.concatenate %105, %107, %109, %111 in 1 : vector<16x8xf32>, vector<16x8xf32>, vector<16x8xf32>, vector<16x8xf32> -> vector<16x32xf32>
    %c0_29 = arith.constant 0 : index
    %c0_30 = arith.constant 0 : index
    %113 = vector.load %arg3[%c0_29, %c0_30] : memref<32x32xf32, #tpu.memory_space<vmem>>, vector<32x32xf32>
    %cst_31 = arith.constant dense<0.000000e+00> : vector<16x32xf32>
    %114 = tpu.matmul %112, %113, %cst_31 {dimension_numbers = #tpu.dot_dimension_numbers<[1], [0], [0], [1], [0, 0, 1, 1], [], []>} : vector<16x32xf32>, vector<32x32xf32>, vector<16x32xf32> -> vector<16x32xf32>
    %c3 = arith.constant 3 : index
    %c0_32 = arith.constant 0 : index
    %115 = vector.load %arg6[%c3, %c0_32] : memref<16x64xf32, #tpu.memory_space<vmem>>, vector<1x32xf32>
    %116 = vector.broadcast %115 : vector<1x32xf32> to vector<16x32xf32>
    %117 = arith.addf %114, %116 : vector<16x32xf32>
    %118 = arith.addf %0, %117 : vector<16x32xf32>
    %c5 = arith.constant 5 : index
    %c0_33 = arith.constant 0 : index
    %119 = vector.load %arg6[%c5, %c0_33] : memref<16x64xf32, #tpu.memory_space<vmem>>, vector<1x32xf32>
    %c6 = arith.constant 6 : index
    %c0_34 = arith.constant 0 : index
    %120 = vector.load %arg6[%c6, %c0_34] : memref<16x64xf32, #tpu.memory_space<vmem>>, vector<1x32xf32>
    %cst_35 = arith.constant dense<0.000000e+00> : vector<16xf32>
    %121 = vector.multi_reduction <add>, %118, %cst_35 [1] : vector<16x32xf32> to vector<16xf32>
    %122 = vector.shape_cast %121 : vector<16xf32> to vector<16x1xf32>
    %cst_36 = arith.constant 3.200000e+01 : f32
    %123 = vector.broadcast %cst_36 : f32 to vector<16x1xf32>
    %124 = arith.divf %122, %123 : vector<16x1xf32>
    %125 = vector.broadcast %124 : vector<16x1xf32> to vector<16x32xf32>
    %126 = arith.subf %118, %125 : vector<16x32xf32>
    %127 = arith.mulf %126, %126 : vector<16x32xf32>
    %cst_37 = arith.constant dense<0.000000e+00> : vector<16xf32>
    %128 = vector.multi_reduction <add>, %127, %cst_37 [1] : vector<16x32xf32> to vector<16xf32>
    %129 = vector.shape_cast %128 : vector<16xf32> to vector<16x1xf32>
    %cst_38 = arith.constant 3.200000e+01 : f32
    %130 = vector.broadcast %cst_38 : f32 to vector<16x1xf32>
    %131 = arith.divf %129, %130 : vector<16x1xf32>
    %132 = vector.broadcast %124 : vector<16x1xf32> to vector<16x32xf32>
    %133 = arith.subf %118, %132 : vector<16x32xf32>
    %cst_39 = arith.constant 9.99999974E-6 : f32
    %134 = vector.broadcast %cst_39 : f32 to vector<16x1xf32>
    %135 = arith.addf %131, %134 : vector<16x1xf32>
    %136 = math.rsqrt %135 : vector<16x1xf32>
    %137 = vector.broadcast %136 : vector<16x1xf32> to vector<16x32xf32>
    %138 = arith.mulf %133, %137 : vector<16x32xf32>
    %139 = vector.broadcast %119 : vector<1x32xf32> to vector<16x32xf32>
    %140 = arith.mulf %138, %139 : vector<16x32xf32>
    %141 = vector.broadcast %120 : vector<1x32xf32> to vector<16x32xf32>
    %142 = arith.addf %140, %141 : vector<16x32xf32>
    %c0_40 = arith.constant 0 : index
    %c0_41 = arith.constant 0 : index
    %143 = vector.load %arg4[%c0_40, %c0_41] : memref<32x64xf32, #tpu.memory_space<vmem>>, vector<32x64xf32>
    %cst_42 = arith.constant dense<0.000000e+00> : vector<16x64xf32>
    %144 = tpu.matmul %142, %143, %cst_42 {dimension_numbers = #tpu.dot_dimension_numbers<[1], [0], [0], [1], [0, 0, 1, 1], [], []>} : vector<16x32xf32>, vector<32x64xf32>, vector<16x64xf32> -> vector<16x64xf32>
    %c9 = arith.constant 9 : index
    %c0_43 = arith.constant 0 : index
    %145 = vector.load %arg6[%c9, %c0_43] : memref<16x64xf32, #tpu.memory_space<vmem>>, vector<1x64xf32>
    %146 = vector.broadcast %145 : vector<1x64xf32> to vector<16x64xf32>
    %147 = arith.addf %144, %146 : vector<16x64xf32>
    %cst_44 = arith.constant 0.000000e+00 : f32
    %148 = vector.broadcast %cst_44 : f32 to vector<16x64xf32>
    %149 = arith.maximumf %147, %148 : vector<16x64xf32>
    %c0_45 = arith.constant 0 : index
    %c0_46 = arith.constant 0 : index
    %150 = vector.load %arg5[%c0_45, %c0_46] : memref<64x32xf32, #tpu.memory_space<vmem>>, vector<64x32xf32>
    %cst_47 = arith.constant dense<0.000000e+00> : vector<16x32xf32>
    %151 = tpu.matmul %149, %150, %cst_47 {dimension_numbers = #tpu.dot_dimension_numbers<[1], [0], [0], [1], [0, 0, 1, 1], [], []>} : vector<16x64xf32>, vector<64x32xf32>, vector<16x32xf32> -> vector<16x32xf32>
    %c4 = arith.constant 4 : index
    %c0_48 = arith.constant 0 : index
    %152 = vector.load %arg6[%c4, %c0_48] : memref<16x64xf32, #tpu.memory_space<vmem>>, vector<1x32xf32>
    %153 = vector.broadcast %152 : vector<1x32xf32> to vector<16x32xf32>
    %154 = arith.addf %151, %153 : vector<16x32xf32>
    %155 = arith.addf %142, %154 : vector<16x32xf32>
    %c7 = arith.constant 7 : index
    %c0_49 = arith.constant 0 : index
    %156 = vector.load %arg6[%c7, %c0_49] : memref<16x64xf32, #tpu.memory_space<vmem>>, vector<1x32xf32>
    %c8 = arith.constant 8 : index
    %c0_50 = arith.constant 0 : index
    %157 = vector.load %arg6[%c8, %c0_50] : memref<16x64xf32, #tpu.memory_space<vmem>>, vector<1x32xf32>
    %cst_51 = arith.constant dense<0.000000e+00> : vector<16xf32>
    %158 = vector.multi_reduction <add>, %155, %cst_51 [1] : vector<16x32xf32> to vector<16xf32>
    %159 = vector.shape_cast %158 : vector<16xf32> to vector<16x1xf32>
    %cst_52 = arith.constant 3.200000e+01 : f32
    %160 = vector.broadcast %cst_52 : f32 to vector<16x1xf32>
    %161 = arith.divf %159, %160 : vector<16x1xf32>
    %162 = vector.broadcast %161 : vector<16x1xf32> to vector<16x32xf32>
    %163 = arith.subf %155, %162 : vector<16x32xf32>
    %164 = arith.mulf %163, %163 : vector<16x32xf32>
    %cst_53 = arith.constant dense<0.000000e+00> : vector<16xf32>
    %165 = vector.multi_reduction <add>, %164, %cst_53 [1] : vector<16x32xf32> to vector<16xf32>
    %166 = vector.shape_cast %165 : vector<16xf32> to vector<16x1xf32>
    %cst_54 = arith.constant 3.200000e+01 : f32
    %167 = vector.broadcast %cst_54 : f32 to vector<16x1xf32>
    %168 = arith.divf %166, %167 : vector<16x1xf32>
    %169 = vector.broadcast %161 : vector<16x1xf32> to vector<16x32xf32>
    %170 = arith.subf %155, %169 : vector<16x32xf32>
    %cst_55 = arith.constant 9.99999974E-6 : f32
    %171 = vector.broadcast %cst_55 : f32 to vector<16x1xf32>
    %172 = arith.addf %168, %171 : vector<16x1xf32>
    %173 = math.rsqrt %172 : vector<16x1xf32>
    %174 = vector.broadcast %173 : vector<16x1xf32> to vector<16x32xf32>
    %175 = arith.mulf %170, %174 : vector<16x32xf32>
    %176 = vector.broadcast %156 : vector<1x32xf32> to vector<16x32xf32>
    %177 = arith.mulf %175, %176 : vector<16x32xf32>
    %178 = vector.broadcast %157 : vector<1x32xf32> to vector<16x32xf32>
    %179 = arith.addf %177, %178 : vector<16x32xf32>
    %c0_56 = arith.constant 0 : index
    %c0_57 = arith.constant 0 : index
    %180 = vector.load %arg7[%c0_56, %c0_57] : memref<16x32xf32, #tpu.memory_space<vmem>>, vector<16x32xf32>
    tpu.vector_store %arg7[%c0_56, %c0_57], %179 {strides = array<i32>} : memref<16x32xf32, #tpu.memory_space<vmem>>, vector<16x32xf32>,
    return
  }
}

</mosaic_0001>

<bundles_post_ra>
// kernel: transformer_encoder_layer.1
= control target key start
LH: loop header
LB: loop body
LE: loop exit
PB: predicated region body
PF: predicated region fallthrough
CT: control target
= control target key end

     0   :  { %vm39_vm0 = vcmask 261120   ;;  %s1158_s19 = smov 32   ;;  %s1531_s0 = inlined_call_operand.vmem [shape: f32[16,32], index: 0, kind: input, shape index: {}]   ;;  %s1532_s1 = inlined_call_operand.vmem [shape: f32[16,32], index: 1, kind: input, shape index: {}]   ;;  %s1533_s2 = inlined_call_operand.vmem [shape: f32[32,96], index: 2, kind: input, shape index: {}]   ;;  %s1534_s3 = inlined_call_operand.vmem [shape: f32[32,32], index: 3, kind: input, shape index: {}]   ;;  %s1535_s4 = inlined_call_operand.vmem [shape: f32[32,64], index: 4, kind: input, shape index: {}]   ;;  %s1536_s5 = inlined_call_operand.vmem [shape: f32[64,32], index: 5, kind: input, shape index: {}]   ;;  %s1537_s6 = inlined_call_operand.vmem [shape: f32[16,64], index: 6, kind: input, shape index: {}]   ;;  %s1538_s7 = inlined_call_operand.hbm [shape: f32[16,32], index: 7, kind: output, shape index: {0}]   ;;  %s1539_s8 = inlined_call_operand.vmem [shape: f32[16,16], index: 8, kind: output, shape index: {1}]  }
   0x1   :  { %v38_v0 = vld [vmem:[%s1533_s2 + $0x18] sm:$0xff]  ;;  %v37_v1 = vld [vmem:[%s1533_s2 + $0x10] sm:$0xff]  ;;  %v1226_v2 = vld [vmem:[%s1531_s0] sm:$0xff] }
   0x2   :  { %64 = vmatpush.msra.mxu0 %v38_v0  ;;  %v31_v3 = vld [vmem:[%s1532_s1] sm:$0xff]  ;;  %1025 = vmatpush.msra.mxu1 %v38_v0  ;;  %v36_v4 = vld [vmem:[%s1533_s2 + $0x8] sm:$0xff] }
   0x3   :  { %v35_v5 = vld [vmem:[%s1533_s2] sm:$0xff]  ;;  %v33_v7 = vadd.f32 %v31_v3, %v1226_v2 }
   0x4   :  { %65 = vmatpush.msra.mxu0 %v37_v1  ;;  %v1078_v6 = vld [vmem:[%s1537_s6 + $0x1] ss:$0 sm:$0xff]  ;;  %1026 = vmatpush.msra.mxu1 %v37_v1 }
   0x5   :  { %88 = vrot.lane.b32.xlu0 %v1078_v6, %s1158_s19 }
   0x6   :  { %66 = vmatpush.msra.mxu0 %v36_v4  ;;  %1027 = vmatpush.msra.mxu1 %v36_v4 }
   0x7   :  { %14 = vsyncpa [#allocation3], 0  ;;  %v1245_v8 = vld [vmem:[%s1531_s0 + $0x8] sm:$0xff]  ;;  %s1159_s0 = smov 112   ;;  %s1160_s23 = smov 120   ;;  %vm206_vm1 = vcmask 64512   ;;  %v157_v54 = vlaneseq }
   0x8   :  { %67 = vmatpush.msra.mxu0 %v35_v5  ;;  %1028 = vmatpush.msra.mxu1 %v35_v5  ;;  %v32_v9 = vld [vmem:[%s1532_s1 + $0x8] sm:$0xff]  ;;  %s1161_s1 = smov 104   ;;  %s1162_s24 = smov 96   ;;  %v1079_v20 = vld [vmem:[%s1537_s6] ss:$0 sm:$0xff]  ;;  %vm351_vm3 = vcmask 130048  }
   0x9   :  { %991 = vmatmul.msk.f32.vlgmr.msra.gmra.mxu0 %vm39_vm0, %v33_v7  ;;  %994 = vmatmul.msk.f32.vlgmr.msra.gmra.mxu1 %vm39_vm0, %v1245_v8  ;;  %v34_v10 = vadd.f32 %v32_v9, %v1245_v8  ;;  %v1080_v29 = vld [vmem:[%s1537_s6 + $0x2] ss:$0 sm:$0xff]  ;;  %s1163_s29 = smov 64   ;;  %v158_v55 = vshrl.u32 %v157_v54, 7  ;;  %v161_v56 = vand.u32 127, %v157_v54  ;;  %s1166_s12 = smov 8  }
   0xa   :  { %v1164_v59 = vmov -1e+30   ;;  %s1167_s13 = smov 16   ;;  %s1168_s14 = smov 24  }
   0xb   :  { %v166_v57 = vand.u32 1, %v158_v55  ;;  %v190_v58 = vand.u32 1, %v161_v56  ;;  %v159_v1 = vadd.s32 8, %v158_v55  ;;  %s975_s30 = sshll.u32 %s1538_s7, 4  ;;  %s1170_s9 = smov [#allocation2]   ;;  %s976_s30 = int_to_ptr.hbm [resolvable:$true] %s975_s30 }
   0xc   :  { %s973_s10 = sshll.u32 %s1170_s9, 4  ;;  %s974_s10 = int_to_ptr.vmem [resolvable:$true] %s973_s10 }
   0xd   :  { %vm198_vm2 = vcmp.eq.s32.totalorder %v166_v57, %v190_v58  ;;  %v173_v3 = vand.u32 1, %v159_v1 }
   0xe   :  { %v200_v60 = vsel %vm198_vm2, 0.0, %v1164_v59 }
   0xf   :  { %vm199_vm4 = vcmp.eq.s32.totalorder %v173_v3, %v190_v58 }
  0x10   :  { %v201_v5 = vsel %vm199_vm4, 0.0, %v1164_v59 }
  0x11   :  { %992 = vmatmul.msk.f32.gmra.mxu0 %vm39_vm0, %v34_v10 }
  0x19   :  { %993 = vmatmul.msk.f32.gmra.mxu0 %vm39_vm0, %v1226_v2 }
  0x77   :  { %v89_v11 = vpop.permute.xlu0 %88 }
  0x86   :  { %v69_v12 = vpop.f32.mrf.mxu0  ;;  %v78_v49 = vpop.f32.mrf.mxu1 }
  0x87   :  { %v91_v13 = vadd.f32 %v89_v11, %v69_v12  ;;  %v83_v21 = vadd.f32 %v1079_v20, %v69_v12 }
  0x89   :  { %135 = vrot.lane.b32.xlu2 %v91_v13, %s1159_s0  ;;  %131 = vrot.lane.b32.xlu1 %v91_v13, %s1160_s23  ;;  %v121_v27 = vmul.f32 0.35355338, %v83_v21 }
  0x8e   :  { %v72_v14 = vpop.f32.mrf.mxu0 }
  0x8f   :  { %v92_v15 = vadd.f32 %v89_v11, %v72_v14  ;;  %v84_v22 = vadd.f32 %v1079_v20, %v72_v14 }
  0x91   :  { %141 = vrot.lane.b32.xlu2 %v92_v15, %s1161_s1  ;;  %137 = vrot.lane.b32.xlu1 %v92_v15, %s1159_s0  ;;  %v122_v28 = vmul.f32 0.35355338, %v84_v22 }
  0x92   :  { %133 = vrot.lane.b32.xlu0 %v92_v15, %s1160_s23 }
  0x96   :  { %v75_v48 = vpop.f32.mrf.mxu0 }
  0x99   :  { %204 = vrot.lane.b32.xlu1 %v92_v15, %s1162_s24 }
  0x9a   :  { %139 = vrot.lane.b32.xlu0 %v91_v13, %s1161_s1 }
  0xa2   :  { %202 = vrot.lane.b32.xlu0 %v91_v13, %s1162_s24 }
  0xe3   :  { %v136_v17 = vpop.permute.xlu2 %135 }
  0xeb   :  { %v142_v23 = vpop.permute.xlu2 %141 }
  0xfb   :  { %v132_v16 = vpop.permute.xlu1 %131 }
  0xfc   :  { %240 = vrot.lane.b32.xlu1 %v132_v16, %s1162_s24 }
 0x103   :  { %v138_v18 = vpop.permute.xlu1 %137 }
 0x104   :  { %v134_v19 = vpop.permute.xlu0 %133  ;;  %277 = vrot.lane.b32.xlu1 %v136_v17, %s1162_s24  ;;  %279 = vrot.lane.b32.xlu0 %v138_v18, %s1162_s24 }
 0x105   :  { %242 = vrot.lane.b32.xlu2 %v134_v19, %s1162_s24 }
 0x10b   :  { %v205_v24 = vpop.permute.xlu1 %204 }
 0x10c   :  { %v140_v25 = vpop.permute.xlu0 %139  ;;  %316 = vrot.lane.b32.xlu1 %v142_v23, %s1162_s24  ;;  %995 = vmatpush.xpose.msk.msrb.mxu1 %vm206_vm1, %v205_v24 }
 0x10d   :  { %103 = vrot.lane.b32.xlu2 %v83_v21, %s1160_s23  ;;  %105 = vrot.lane.b32.xlu0 %v84_v22, %s1160_s23 }
 0x114   :  { %v203_v26 = vpop.permute.xlu0 %202  ;;  %111 = vrot.lane.b32.xlu1 %v84_v22, %s1159_s0 }
 0x115   :  { %109 = vrot.lane.b32.xlu2 %v83_v21, %s1159_s0  ;;  %996 = vmatpush.xpose.msk.msrb.mxu1 %vm206_vm1, %v203_v26 }
 0x116   :  { %115 = vrot.lane.b32.xlu0 %v83_v21, %s1161_s1 }
 0x118   :  { %997 = vmatmul.msk.f32.vlgmr.msrb.gmra.mxu1 %vm206_vm1, %v121_v27 }
 0x11d   :  { %314 = vrot.lane.b32.xlu2 %v140_v25, %s1162_s24 }
 0x11e   :  { %96 = vrot.lane.b32.xlu0 %v1080_v29, %s1163_s29 }
 0x120   :  { %998 = vmatmul.msk.f32.gmra.mxu1 %vm206_vm1, %v122_v28 }
 0x125   :  { %117 = vrot.lane.b32.xlu2 %v84_v22, %s1161_s1 }
 0x15f   :  { %v243_v30 = vpop.permute.xlu2 %242 }
 0x160   :  { %999 = vmatpush.xpose.msk.msra.mxu2 %vm206_vm1, %v243_v30 }
 0x167   :  { %v104_v31 = vpop.permute.xlu2 %103 }
 0x168   :  { %v123_v33 = vmul.f32 0.35355338, %v104_v31 }
 0x16e   :  { %v241_v32 = vpop.permute.xlu1 %240 }
 0x16f   :  { %1000 = vmatpush.xpose.msk.msra.mxu2 %vm206_vm1, %v241_v32  ;;  %v110_v36 = vpop.permute.xlu2 %109 }
 0x170   :  { %v125_v37 = vmul.f32 0.35355338, %v110_v36 }
 0x172   :  { %1001 = vmatmul.msk.f32.vlgmr.msra.gmra.mxu2 %vm206_vm1, %v123_v33 }
 0x176   :  { %v278_v34 = vpop.permute.xlu1 %277  ;;  %v280_v35 = vpop.permute.xlu0 %279 }
 0x177   :  { %1003 = vmatpush.xpose.msk.msra.mxu3 %vm206_vm1, %v280_v35  ;;  %v315_v41 = vpop.permute.xlu2 %314 }
 0x17b   :  { %1004 = vmatpush.xpose.msk.msra.mxu3 %vm206_vm1, %v278_v34 }
 0x17e   :  { %v317_v38 = vpop.permute.xlu1 %316  ;;  %1005 = vmatmul.msk.f32.vlgmr.msra.gmra.mxu3 %vm206_vm1, %v125_v37 }
 0x17f   :  { %v106_v39 = vpop.permute.xlu0 %105  ;;  %1007 = vmatpush.xpose.msk.msra.mxu1 %vm206_vm1, %v317_v38  ;;  %v118_v46 = vpop.permute.xlu2 %117 }
 0x180   :  { %v124_v40 = vmul.f32 0.35355338, %v106_v39  ;;  %v128_v47 = vmul.f32 0.35355338, %v118_v46 }
 0x182   :  { %1002 = vmatmul.msk.f32.gmra.mxu2 %vm206_vm1, %v124_v40 }
 0x183   :  { %1008 = vmatpush.xpose.msk.msra.mxu1 %vm206_vm1, %v315_v41 }
 0x186   :  { %v112_v42 = vpop.permute.xlu1 %111 }
 0x187   :  { %v126_v43 = vmul.f32 0.35355338, %v112_v42 }
 0x188   :  { %v116_v44 = vpop.permute.xlu0 %115 }
 0x189   :  { %v127_v45 = vmul.f32 0.35355338, %v116_v44  ;;  %1006 = vmatmul.msk.f32.gmra.mxu3 %vm206_vm1, %v126_v43 }
 0x18b   :  { %1009 = vmatmul.msk.f32.vlgmr.msra.gmra.mxu1 %vm206_vm1, %v127_v45 }
 0x190   :  { %v97_v50 = vpop.permute.xlu0 %96 }
 0x191   :  { %v100_v51 = vadd.f32 %v97_v50, %v78_v49  ;;  %v99_v52 = vadd.f32 %v97_v50, %v75_v48 }
 0x193   :  { %1010 = vmatmul.msk.f32.gmra.mxu1 %vm206_vm1, %v128_v47  ;;  %v1291_v53 = vpack.i.bf16 %v99_v52, %v100_v51 }
 0x195   :  { %1044 = vrot.lane.b32.xlu0 %v1291_v53, %s1160_s23  ;;  %v234_v62 = vpop.f32.mrf.mxu1 }
 0x196   :  { %v1298_v13 = vadd.f32 %v234_v62, %v200_v60 }
 0x198   :  { %v352_v16 = vsel %vm351_vm3, %v1298_v13, -inf }
 0x19d   :  { %v237_v4 = vpop.f32.mrf.mxu1 }
 0x19e   :  { %v1309_v24 = vadd.f32 %v237_v4, %v201_v5 }
 0x1a0   :  { %v355_v25 = vsel %vm351_vm3, %v1309_v24, -inf }
 0x1f5   :  { %v271_v61 = vpop.f32.mrf.mxu2 }
 0x1f6   :  { %v272_v63 = vadd.f32 %v271_v61, %v200_v60 }
 0x1f8   :  { %v358_v0 = vsel %vm351_vm3, %v272_v63, -inf }
 0x1f9   :  { %359 = vmax.xlane.f32.xlu1 %v358_v0 }
 0x201   :  { %v308_v14 = vpop.f32.mrf.mxu3 }
 0x202   :  { %v309_v15 = vadd.f32 %v308_v14, %v200_v60 }
 0x204   :  { %v364_v17 = vsel %vm351_vm3, %v309_v15, -inf }
 0x205   :  { %v274_v6 = vpop.f32.mrf.mxu2 }
 0x206   :  { %v275_v7 = vadd.f32 %v274_v6, %v201_v5 }
 0x207   :  { %v1045_v34 = vpop.permute.xlu0 %1044 }
 0x208   :  { %v345_v9 = vpop.f32.mrf.mxu1  ;;  %v361_v10 = vsel %vm351_vm3, %v275_v7, -inf }
 0x209   :  { %v346_v11 = vadd.f32 %v345_v9, %v200_v60  ;;  %362 = vmax.xlane.f32.xlu0 %v361_v10 }
 0x20b   :  { %v370_v12 = vsel %vm351_vm3, %v346_v11, -inf }
 0x20c   :  { %371 = vmax.xlane.f32.xlu2 %v370_v12  ;;  %v311_v21 = vpop.f32.mrf.mxu3 }
 0x20d   :  { %v312_v22 = vadd.f32 %v311_v21, %v201_v5 }
 0x20f   :  { %v367_v23 = vsel %vm351_vm3, %v312_v22, -inf }
 0x210   :  { %v348_v18 = vpop.f32.mrf.mxu1 }
 0x211   :  { %353 = vmax.xlane.f32.xlu0 %v352_v16  ;;  %v349_v19 = vadd.f32 %v348_v18, %v201_v5 }
 0x212   :  { %1049 = vrot.lane.b32.xlu1 %v1291_v53, %s1159_s0 }
 0x213   :  { %v373_v20 = vsel %vm351_vm3, %v349_v19, -inf }
 0x214   :  { %365 = vmax.xlane.f32.xlu2 %v364_v17 }
 0x21c   :  { %374 = vmax.xlane.f32.xlu2 %v373_v20 }
 0x234   :  { %1054 = vrot.lane.b32.xlu2 %v1291_v53, %s1161_s1 }
 0x23c   :  { %368 = vmax.xlane.f32.xlu1 %v367_v23 }
 0x244   :  { %356 = vmax.xlane.f32.xlu1 %v355_v25 }
 0x26c   :  { %v360_v26 = vpop.xlane.xlu1 %359 }
 0x26d   :  { %v378_v27 = vsub.f32 %v272_v63, %v360_v26 }
 0x26f   :  { %v388_v28 = vmul.f32 1.442695, %v378_v27 }
 0x271   :  { %1088 = vpow2.f32 %v388_v28 }
 0x277   :  { %v1313_v29 = vpop.eup %1088 }
 0x278   :  { %v406_v30 = vsel %vm351_vm3, %v1313_v29, 0.0 }
 0x279   :  { %407 = vadd.xlane.f32.xlu2 %v406_v30 }
 0x27c   :  { %v363_v40 = vpop.xlane.xlu0 %362 }
 0x27d   :  { %v379_v44 = vsub.f32 %v275_v7, %v363_v40 }
 0x27f   :  { %v372_v31 = vpop.xlane.xlu2 %371  ;;  %v390_v47 = vmul.f32 1.442695, %v379_v44 }
 0x280   :  { %v382_v32 = vsub.f32 %v346_v11, %v372_v31 }
 0x282   :  { %v396_v33 = vmul.f32 1.442695, %v382_v32 }
 0x284   :  { %1090 = vpow2.f32 %v396_v33  ;;  %v1050_v52 = vpop.permute.xlu1 %1049  ;;  %v354_v63 = vpop.xlane.xlu0 %353 }
 0x285   :  { %v1052_v59 = vunpack.i.h.bf16 %v1050_v52  ;;  %v376_v0 = vsub.f32 %v1298_v13, %v354_v63  ;;  %v1051_v5 = vunpack.i.l.bf16 %v1050_v52 }
 0x287   :  { %v366_v35 = vpop.xlane.xlu2 %365  ;;  %v384_v1 = vmul.f32 1.442695, %v376_v0 }
 0x288   :  { %v380_v36 = vsub.f32 %v309_v15, %v366_v35 }
 0x28a   :  { %v1317_v37 = vpop.eup %1090  ;;  %v392_v38 = vmul.f32 1.442695, %v380_v36 }
 0x28b   :  { %v418_v39 = vsel %vm351_vm3, %v1317_v37, 0.0 }
 0x28c   :  { %1092 = vpow2.f32 %v392_v38  ;;  %419 = vadd.xlane.f32.xlu0 %v418_v39 }
 0x28f   :  { %v375_v41 = vpop.xlane.xlu2 %374 }
 0x290   :  { %v383_v42 = vsub.f32 %v349_v19, %v375_v41 }
 0x292   :  { %v1321_v43 = vpop.eup %1092  ;;  %v398_v45 = vmul.f32 1.442695, %v383_v42 }
 0x293   :  { %v412_v46 = vsel %vm351_vm3, %v1321_v43, 0.0 }
 0x294   :  { %1094 = vpow2.f32 %v398_v45  ;;  %413 = vadd.xlane.f32.xlu0 %v412_v46 }
 0x295   :  { %1096 = vpow2.f32 %v390_v47 }
 0x297   :  { %v1055_v57 = vpop.permute.xlu2 %1054 }
 0x298   :  { %v1057_v58 = vunpack.i.h.bf16 %v1055_v57  ;;  %v1056_v4 = vunpack.i.l.bf16 %v1055_v57 }
 0x29a   :  { %v1325_v48 = vpop.eup %1094  ;;  %v1068_v61 = vpack.i.bf16 %v1057_v58, %v1052_v59  ;;  %v1063_v7 = vpack.i.bf16 %v1056_v4, %v1051_v5 }
 0x29b   :  { %v421_v49 = vsel %vm351_vm3, %v1325_v48, 0.0  ;;  %v1329_v50 = vpop.eup %1096 }
 0x29c   :  { %422 = vadd.xlane.f32.xlu1 %v421_v49  ;;  %v409_v51 = vsel %vm351_vm3, %v1329_v50, 0.0 }
 0x2a4   :  { %410 = vadd.xlane.f32.xlu1 %v409_v51 }
 0x2a8   :  { %1059 = vrot.lane.b32.xlu0 %v1045_v34, %s1163_s29 }
 0x2af   :  { %v369_v54 = vpop.xlane.xlu1 %368 }
 0x2b0   :  { %v381_v55 = vsub.f32 %v312_v22, %v369_v54 }
 0x2b2   :  { %v394_v56 = vmul.f32 1.442695, %v381_v55 }
 0x2b4   :  { %1098 = vpow2.f32 %v394_v56 }
 0x2b5   :  { %1100 = vpow2.f32 %v384_v1 }
 0x2b7   :  { %v357_v9 = vpop.xlane.xlu1 %356 }
 0x2b8   :  { %v377_v10 = vsub.f32 %v1309_v24, %v357_v9 }
 0x2ba   :  { %v1334_v60 = vpop.eup %1098  ;;  %v386_v11 = vmul.f32 1.442695, %v377_v10 }
 0x2bb   :  { %v415_v62 = vsel %vm351_vm3, %v1334_v60, 0.0  ;;  %v1342_v3 = vpop.eup %1100 }
 0x2bc   :  { %416 = vadd.xlane.f32.xlu2 %v415_v62  ;;  %v400_v6 = vsel %vm351_vm3, %v1342_v3, 0.0  ;;  %1102 = vpow2.f32 %v386_v11 }
 0x2bd   :  { %1069 = vrot.lane.b32.xlu1 %v1068_v61, %s1163_s29 }
 0x2c2   :  { %v1348_v12 = vpop.eup %1102 }
 0x2c3   :  { %v403_v13 = vsel %vm351_vm3, %v1348_v12, 0.0 }
 0x2c5   :  { %1074 = vrot.lane.b32.xlu1 %v1291_v53, %s1163_s29 }
 0x2d2   :  { %401 = vadd.xlane.f32.xlu0 %v400_v6 }
 0x2d4   :  { %1064 = vrot.lane.b32.xlu2 %v1063_v7, %s1163_s29 }
 0x2ec   :  { %v408_v53 = vpop.xlane.xlu2 %407 }
 0x2ed   :  { %1104 = vrcp.f32 %v408_v53  ;;  %v463_v22 = vand.u32 2147483648, %v408_v53  ;;  %vm457_vm6 = vweird.f32 %v408_v53  ;;  %v461_v23 = vand.u32 2147483647, %v408_v53 }
 0x2ef   :  { %v464_v26 = vor.u32 1.1754944e-38, %v463_v22  ;;  %vm462_vm8 = vcmp.eq.f32.partialorder %v461_v23, 8.507059e+37 }
 0x2f3   :  { %v1105_v14 = vpop.eup %1104 }
 0x2f4   :  { %v453_v15 = vmul.f32 %v1105_v14, %v408_v53  ;;  %vm458_vm5 = vweird.f32 %v1105_v14 }
 0x2f5   :  { %vm459_vm7 = vmor %vm457_vm6, %vm458_vm5 }
 0x2f6   :  { %v454_v17 = vsub.f32 1.0, %v453_v15 }
 0x2f8   :  { %v455_v19 = vmul.f32 %v1105_v14, %v454_v17 }
 0x2fa   :  { %v456_v21 = vadd.f32 %v1105_v14, %v455_v19 }
 0x2fc   :  { %v460_v25 = vsel %vm459_vm7, %v1105_v14, %v456_v21 }
 0x2fd   :  { %404 = vadd.xlane.f32.xlu2 %v403_v13  ;;  %v465_v30 = vsel %vm462_vm8, %v464_v26, %v460_v25 }
 0x2fe   :  { %v1361_v33 = vmul.f32 %v1313_v29, %v465_v30 }
 0x2ff   :  { %v1352_v16 = vpop.xlane.xlu0 %419 }
 0x300   :  { %v519_v0 = vand.u32 2147483648, %v1352_v16  ;;  %vm513_vm4 = vweird.f32 %v1352_v16  ;;  %v517_v4 = vand.u32 2147483647, %v1352_v16 }
 0x302   :  { %v520_v10 = vor.u32 1.1754944e-38, %v519_v0  ;;  %vm518_vm7 = vcmp.eq.f32.partialorder %v517_v4, 8.507059e+37 }
 0x307   :  { %v1356_v20 = vpop.xlane.xlu0 %413 }
 0x308   :  { %v491_v62 = vand.u32 2147483648, %v1356_v20  ;;  %vm485_vm15 = vweird.f32 %v1356_v20 }
 0x30a   :  { %v492_v6 = vor.u32 1.1754944e-38, %v491_v62  ;;  %v545_v62 = vsel %vm351_vm3, %v1361_v33, 0.0 }
 0x30f   :  { %v1354_v18 = vpop.xlane.xlu1 %422 }
 0x317   :  { %v411_v24 = vpop.xlane.xlu1 %410 }
 0x318   :  { %1106 = vrcp.f32 %v411_v24  ;;  %v477_v39 = vand.u32 2147483648, %v411_v24  ;;  %v475_v42 = vand.u32 2147483647, %v411_v24  ;;  %vm471_vm10 = vweird.f32 %v411_v24 }
 0x319   :  { %1108 = vrcp.f32 %v1356_v20 }
 0x31a   :  { %v1060_v27 = vpop.permute.xlu0 %1059  ;;  %1110 = vrcp.f32 %v1352_v16  ;;  %v478_v45 = vor.u32 1.1754944e-38, %v477_v39  ;;  %vm476_vm12 = vcmp.eq.f32.partialorder %v475_v42, 8.507059e+37  ;;  %v1165_v42 = vmov 4.0  }
 0x31b   :  { %v1061_v28 = vunpack.i.l.bf16 %v1060_v27  ;;  %v1062_v31 = vunpack.i.h.bf16 %v1060_v27  ;;  %1112 = vrcp.f32 %v1354_v18 }
 0x31d   :  { %630 = vmatpush.msrb.mxu3 %v1061_v28 }
 0x31e   :  { %v1107_v32 = vpop.eup %1106 }
 0x31f   :  { %v467_v34 = vmul.f32 %v1107_v32, %v411_v24  ;;  %631 = vmatpush.msrb.mxu3 %v1062_v31  ;;  %v1109_v35 = vpop.eup %1108  ;;  %vm472_vm9 = vweird.f32 %v1107_v32 }
 0x320   :  { %1013 = vmatmul.msk.f32.vlgmr.msrb.gmra.mxu3 %vm351_vm3, %v1361_v33  ;;  %v1111_v38 = vpop.eup %1110  ;;  %v481_v40 = vmul.f32 %v1109_v35, %v1356_v20  ;;  %vm473_vm11 = vmor %vm471_vm10, %vm472_vm9  ;;  %vm486_vm13 = vweird.f32 %v1109_v35  ;;  %vm527_vm10 = vweird.f32 %v1354_v18 }
 0x321   :  { %v468_v36 = vsub.f32 1.0, %v467_v34  ;;  %v509_v44 = vmul.f32 %v1111_v38, %v1352_v16  ;;  %v1371_v54 = vpop.eup %1112  ;;  %vm514_vm14 = vweird.f32 %v1111_v38  ;;  %vm487_vm2 = vmor %vm485_vm15, %vm486_vm13  ;;  %v533_v16 = vand.u32 2147483648, %v1354_v18 }
 0x322   :  { %v482_v46 = vsub.f32 1.0, %v481_v40  ;;  %v523_v57 = vmul.f32 %v1371_v54, %v1354_v18  ;;  %vm515_vm5 = vmor %vm513_vm4, %vm514_vm14  ;;  %vm528_vm8 = vweird.f32 %v1371_v54 }
 0x323   :  { %v469_v41 = vmul.f32 %v1107_v32, %v468_v36  ;;  %v510_v51 = vsub.f32 1.0, %v509_v44 }
 0x324   :  { %v483_v55 = vmul.f32 %v1109_v35, %v482_v46  ;;  %v524_v1 = vsub.f32 1.0, %v523_v57 }
 0x325   :  { %v470_v29 = vadd.f32 %v1107_v32, %v469_v41  ;;  %v511_v56 = vmul.f32 %v1111_v38, %v510_v51 }
 0x326   :  { %v484_v58 = vadd.f32 %v1109_v35, %v483_v55  ;;  %v525_v11 = vmul.f32 %v1371_v54, %v524_v1 }
 0x327   :  { %v474_v47 = vsel %vm473_vm11, %v1107_v32, %v470_v29  ;;  %v512_v63 = vadd.f32 %v1111_v38, %v511_v56  ;;  %v531_v32 = vand.u32 2147483647, %v1354_v18 }
 0x328   :  { %v479_v49 = vsel %vm476_vm12, %v478_v45, %v474_v47  ;;  %v488_v5 = vsel %vm487_vm2, %v1109_v35, %v484_v58  ;;  %v526_v27 = vadd.f32 %v1371_v54, %v525_v11  ;;  %vm529_vm12 = vmor %vm527_vm10, %vm528_vm8 }
 0x329   :  { %v1369_v52 = vmul.f32 %v1329_v50, %v479_v49  ;;  %v489_v50 = vand.u32 2147483647, %v1356_v20  ;;  %v516_v7 = vsel %vm515_vm5, %v1111_v38, %v512_v63  ;;  %v534_v38 = vor.u32 1.1754944e-38, %v533_v16 }
 0x32a   :  { %v521_v17 = vsel %vm518_vm7, %v520_v10, %v516_v7  ;;  %v530_v36 = vsel %vm529_vm12, %v1371_v54, %v526_v27  ;;  %vm532_vm15 = vcmp.eq.f32.partialorder %v531_v32, 8.507059e+37  ;;  %vm737_vm12 = vcmask 195584  }
 0x32b   :  { %1014 = vmatmul.msk.f32.gmra.mxu3 %vm351_vm3, %v1369_v52  ;;  %vm490_vm6 = vcmp.eq.f32.partialorder %v489_v50, 8.507059e+37  ;;  %v535_v18 = vsel %vm532_vm15, %v534_v38, %v530_v36  ;;  %v552_v16 = vsel %vm351_vm3, %v1369_v52, 0.0  ;;  %v741_v36 = vld [vmem:[%s1534_s3 + $0x8] sm:$0xff]  ;;  %v740_v38 = vld [vmem:[%s1534_s3] sm:$0xff] }
 0x32c   :  { %v493_v53 = vsel %vm490_vm6, %v492_v6, %v488_v5  ;;  %v543_v41 = vmul.f32 %v1325_v48, %v535_v18 }
 0x32d   :  { %v1386_v23 = vmul.f32 %v1321_v43, %v493_v53  ;;  %v542_v43 = vmul.f32 %v1317_v37, %v521_v17 }
 0x32f   :  { %v1070_v59 = vpop.permute.xlu1 %1069  ;;  %v417_v61 = vpop.xlane.xlu2 %416  ;;  %v547_v1 = vsel %vm351_vm3, %v1386_v23, 0.0  ;;  %v549_v5 = vsel %vm351_vm3, %v542_v43, 0.0 }
 0x330   :  { %1114 = vrcp.f32 %v417_v61  ;;  %v505_v24 = vand.u32 2147483648, %v417_v61  ;;  %v1071_v26 = vunpack.i.l.bf16 %v1070_v59  ;;  %v1072_v28 = vunpack.i.h.bf16 %v1070_v59 }
 0x331   :  { %v503_v31 = vand.u32 2147483647, %v417_v61  ;;  %vm499_vm11 = vweird.f32 %v417_v61  ;;  %1116 = vrcp.f32 %v1165_v42 }
 0x332   :  { %v506_v35 = vor.u32 1.1754944e-38, %v505_v24 }
 0x333   :  { %vm504_vm14 = vcmp.eq.f32.partialorder %v503_v31, 8.507059e+37 }
 0x336   :  { %v1115_v9 = vpop.eup %1114 }
 0x337   :  { %v495_v13 = vmul.f32 %v1115_v9, %v417_v61  ;;  %v1075_v14 = vpop.permute.xlu1 %1074  ;;  %v1065_v15 = vpop.permute.xlu2 %1064  ;;  %vm500_vm9 = vweird.f32 %v1115_v9 }
 0x338   :  { %v1067_v19 = vunpack.i.h.bf16 %v1065_v15  ;;  %v1076_v20 = vunpack.i.l.bf16 %v1075_v14  ;;  %v1066_v21 = vunpack.i.l.bf16 %v1065_v15  ;;  %v1077_v25 = vunpack.i.h.bf16 %v1075_v14  ;;  %vm501_vm13 = vmor %vm499_vm11, %vm500_vm9  ;;  %v1117_v29 = vpop.eup %1116 }
 0x339   :  { %v496_v22 = vsub.f32 1.0, %v495_v13  ;;  %v559_v47 = vmul.f32 4.0, %v1117_v29  ;;  %vm563_vm7 = vweird.f32 %v1117_v29 }
 0x33a   :  { %595 = vmatpush.msrb.mxu2 %v1076_v20  ;;  %665 = vmatpush.msrb.mxu0 %v1066_v21 }
 0x33b   :  { %v497_v30 = vmul.f32 %v1115_v9, %v496_v22  ;;  %700 = vmatpush.msrb.mxu1 %v1067_v19 }
 0x33c   :  { %596 = vmatpush.msrb.mxu2 %v1077_v25  ;;  %666 = vmatpush.msrb.mxu0 %v1071_v26  ;;  %v556_v26 = vsel %vm351_vm3, %v543_v41, 0.0 }
 0x33d   :  { %701 = vmatpush.msrb.mxu1 %v1072_v28  ;;  %1015 = vmatmul.msk.f32.vlgmr.msrb.gmra.mxu0 %vm351_vm3, %v1386_v23  ;;  %v498_v34 = vadd.f32 %v1115_v9, %v497_v30 }
 0x33e   :  { %1017 = vmatmul.msk.f32.vlgmr.msrb.gmra.mxu1 %vm351_vm3, %v542_v43 }
 0x33f   :  { %v502_v39 = vsel %vm501_vm13, %v1115_v9, %v498_v34  ;;  %v743_v34 = vld [vmem:[%s1534_s3 + $0x18] sm:$0xff] }
 0x340   :  { %v507_v37 = vsel %vm504_vm14, %v506_v35, %v502_v39  ;;  %v742_v35 = vld [vmem:[%s1534_s3 + $0x10] sm:$0xff]  ;;  %764 = vmatpush.msra.mxu2 %v743_v34 }
 0x341   :  { %v541_v40 = vmul.f32 %v1334_v60, %v507_v37  ;;  %v560_v60 = vsub.f32 1.0, %v559_v47 }
 0x342   :  { %765 = vmatpush.msra.mxu2 %v742_v35 }
 0x343   :  { %v561_v58 = vmul.f32 %v1117_v29, %v560_v60  ;;  %v554_v24 = vsel %vm351_vm3, %v541_v40, 0.0 }
 0x344   :  { %766 = vmatpush.msra.mxu2 %v741_v36  ;;  %v1082_v36 = vld [vmem:[%s1537_s6 + $0x5] ss:$0 sm:$0xff] }
 0x345   :  { %v402_v44 = vpop.xlane.xlu0 %401  ;;  %1016 = vmatmul.msk.f32.gmra.mxu0 %vm351_vm3, %v541_v40  ;;  %v562_v50 = vadd.f32 %v1117_v29, %v561_v58 }
 0x346   :  { %1118 = vrcp.f32 %v402_v44  ;;  %1018 = vmatmul.msk.f32.gmra.mxu1 %vm351_vm3, %v543_v41  ;;  %v435_v51 = vand.u32 2147483648, %v402_v44  ;;  %v433_v55 = vand.u32 2147483647, %v402_v44  ;;  %vm429_vm4 = vweird.f32 %v402_v44  ;;  %767 = vmatpush.msra.mxu2 %v740_v38 }
 0x347   :  { %v564_v6 = vsel %vm563_vm7, %v1117_v29, %v562_v50 }
 0x348   :  { %v436_v48 = vor.u32 1.1754944e-38, %v435_v51  ;;  %vm434_vm6 = vcmp.eq.f32.partialorder %v433_v55, 8.507059e+37  ;;  %v1081_v55 = vld [vmem:[%s1537_s6 + $0x3] ss:$0 sm:$0xff] }
 0x34c   :  { %v1119_v45 = vpop.eup %1118 }
 0x34d   :  { %v425_v46 = vmul.f32 %v1119_v45, %v402_v44  ;;  %vm430_vm2 = vweird.f32 %v1119_v45 }
 0x34e   :  { %vm431_vm5 = vmor %vm429_vm4, %vm430_vm2 }
 0x34f   :  { %v426_v49 = vsub.f32 1.0, %v425_v46 }
 0x351   :  { %v427_v54 = vmul.f32 %v1119_v45, %v426_v49 }
 0x353   :  { %v428_v56 = vadd.f32 %v1119_v45, %v427_v54 }
 0x355   :  { %v432_v57 = vsel %vm431_vm5, %v1119_v45, %v428_v56  ;;  %vm883_vm5 = vcmask 523264  }
 0x356   :  { %v437_v59 = vsel %vm434_vm6, %v436_v48, %v432_v57 }
 0x357   :  { %v536_v61 = vmul.f32 %v1342_v3, %v437_v59 }
 0x359   :  { %v544_v63 = vsel %vm351_vm3, %v536_v61, 0.0  ;;  %1011 = vmatmul.msk.f32.vlgmr.msrb.gmra.mxu2 %vm351_vm3, %v536_v61 }
 0x35a   :  { %v546_v0 = vadd.f32 %v545_v62, %v544_v63  ;;  %v1169_v63 = vmov 32.0  }
 0x35c   :  { %v548_v4 = vadd.f32 %v547_v1, %v546_v0 }
 0x35e   :  { %v550_v7 = vadd.f32 %v549_v5, %v548_v4 }
 0x360   :  { %v565_v9 = vmul.f32 %v564_v6, %v550_v7 }
 0x362   :  { %567 = vst.msk [vmem:[%s1539_s8] sm:$0xff] %vm351_vm3, %v565_v9 }
 0x370   :  { %v405_v3 = vpop.xlane.xlu2 %404 }
 0x371   :  { %1120 = vrcp.f32 %v405_v3  ;;  %v449_v53 = vand.u32 2147483648, %v405_v3  ;;  %v447_v14 = vand.u32 2147483647, %v405_v3  ;;  %vm443_vm9 = vweird.f32 %v405_v3 }
 0x372   :  { %1122 = vrcp.f32 %v1169_v63  ;;  %v1085_v63 = vld [vmem:[%s1537_s6 + $0x4] ss:$0 sm:$0xff] }
 0x373   :  { %v450_v17 = vor.u32 1.1754944e-38, %v449_v53  ;;  %vm448_vm11 = vcmp.eq.f32.partialorder %v447_v14, 8.507059e+37  ;;  %v839_v14 = vld [vmem:[%s1535_s4 + $0x18] sm:$0xff] }
 0x374   :  { %860 = vmatpush.msra.mxu3 %v839_v14 }
 0x377   :  { %v1121_v33 = vpop.eup %1120 }
 0x378   :  { %v439_v10 = vmul.f32 %v1121_v33, %v405_v3  ;;  %vm444_vm8 = vweird.f32 %v1121_v33  ;;  %v1123_v50 = vpop.eup %1122 }
 0x379   :  { %vm445_vm10 = vmor %vm443_vm9, %vm444_vm8  ;;  %v786_v0 = vmul.f32 32.0, %v1123_v50 }
 0x37a   :  { %v440_v11 = vsub.f32 1.0, %v439_v10 }
 0x37b   :  { %v787_v1 = vsub.f32 1.0, %v786_v0 }
 0x37c   :  { %v441_v13 = vmul.f32 %v1121_v33, %v440_v11 }
 0x37d   :  { %v788_v4 = vmul.f32 %v1123_v50, %v787_v1 }
 0x37e   :  { %v442_v15 = vadd.f32 %v1121_v33, %v441_v13 }
 0x37f   :  { %v789_v5 = vadd.f32 %v1123_v50, %v788_v4 }
 0x380   :  { %v446_v19 = vsel %vm445_vm10, %v1121_v33, %v442_v15  ;;  %v838_v15 = vld [vmem:[%s1535_s4 + $0x10] sm:$0xff] }
 0x381   :  { %v451_v20 = vsel %vm448_vm11, %v450_v17, %v446_v19  ;;  %861 = vmatpush.msra.mxu3 %v838_v15  ;;  %v837_v17 = vld [vmem:[%s1535_s4 + $0x8] sm:$0xff]  ;;  %v836_v19 = vld [vmem:[%s1535_s4] sm:$0xff] }
 0x382   :  { %v537_v21 = vmul.f32 %v1348_v12, %v451_v20 }
 0x383   :  { %862 = vmatpush.msra.mxu3 %v837_v17 }
 0x384   :  { %v551_v22 = vsel %vm351_vm3, %v537_v21, 0.0  ;;  %1012 = vmatmul.msk.f32.gmra.mxu2 %vm351_vm3, %v537_v21 }
 0x385   :  { %v553_v23 = vadd.f32 %v552_v16, %v551_v22  ;;  %863 = vmatpush.msra.mxu3 %v836_v19  ;;  %v880_v22 = vld [vmem:[%s1536_s5 + $0x38] sm:$0xff] }
 0x386   :  { %898 = vmatpush.msra.mxu0 %v880_v22 }
 0x387   :  { %v555_v25 = vadd.f32 %v554_v24, %v553_v23  ;;  %v879_v23 = vld [vmem:[%s1536_s5 + $0x30] sm:$0xff]  ;;  %v878_v24 = vld [vmem:[%s1536_s5 + $0x28] sm:$0xff] }
 0x388   :  { %899 = vmatpush.msra.mxu0 %v879_v23 }
 0x389   :  { %v557_v27 = vadd.f32 %v556_v26, %v555_v25 }
 0x38a   :  { %900 = vmatpush.msra.mxu0 %v878_v24 }
 0x38b   :  { %v566_v28 = vmul.f32 %v564_v6, %v557_v27  ;;  %v877_v27 = vld [vmem:[%s1536_s5 + $0x20] sm:$0xff] }
 0x38c   :  { %901 = vmatpush.msra.mxu0 %v877_v27 }
 0x38d   :  { %568 = vst.msk [vmem:[%s1539_s8 + $0x8] sm:$0xff] %vm351_vm3, %v566_v28 }
 0x3a3   :  { %v633_v12 = vpop.f32.mrf.mxu3 }
 0x3ae   :  { %v636_v30 = vpop.f32.mrf.mxu3 }
 0x3af   :  { %713 = vrot.lane.b32.xlu0 %v636_v30, %s1166_s12 }
 0x3ba   :  { %v668_v52 = vpop.f32.mrf.mxu0 }
 0x3bb   :  { %v703_v31 = vpop.f32.mrf.mxu1  ;;  %719 = vrot.lane.b32.xlu1 %v668_v52, %s1167_s13  ;;  %v876_v52 = vld [vmem:[%s1536_s5 + $0x18] sm:$0xff] }
 0x3bc   :  { %902 = vmatpush.msra.mxu0 %v876_v52  ;;  %v1086_v52 = vld [vmem:[%s1537_s6 + $0x7] ss:$0 sm:$0xff] }
 0x3c2   :  { %v671_v32 = vpop.f32.mrf.mxu0 }
 0x3c3   :  { %v706_v43 = vpop.f32.mrf.mxu1  ;;  %711 = vrot.lane.b32.xlu1 %v633_v12, %s1166_s12 }
 0x3c4   :  { %729 = vrot.lane.b32.xlu2 %v706_v43, %s1168_s14 }
 0x3cb   :  { %727 = vrot.lane.b32.xlu1 %v703_v31, %s1168_s14 }
 0x3d3   :  { %721 = vrot.lane.b32.xlu1 %v671_v32, %s1167_s13 }
 0x3dc   :  { %v598_v18 = vpop.f32.mrf.mxu2 }
 0x407   :  { %v601_v45 = vpop.f32.mrf.mxu2 }
 0x41e   :  { %v730_v49 = vpop.permute.xlu2 %729 }
 0x421   :  { %v714_v29 = vpop.permute.xlu0 %713 }
 0x422   :  { %v734_v46 = vsel %vm206_vm1, %v601_v45, %v714_v29 }
 0x42d   :  { %v720_v39 = vpop.permute.xlu1 %719 }
 0x435   :  { %v712_v37 = vpop.permute.xlu1 %711 }
 0x436   :  { %v733_v40 = vsel %vm206_vm1, %v598_v18, %v712_v37  ;;  %vm790_vm1 = vweird.f32 %v1123_v50 }
 0x437   :  { %v735_v41 = vsel %vm351_vm3, %v733_v40, %v720_v39  ;;  %v1453_v6 = vsel %vm790_vm1, %v1123_v50, %v789_v5  ;;  %v1083_v40 = vld [vmem:[%s1537_s6 + $0x6] ss:$0 sm:$0xff] }
 0x43d   :  { %v728_v42 = vpop.permute.xlu1 %727 }
 0x43e   :  { %v738_v44 = vsel %vm737_vm12, %v735_v41, %v728_v42 }
 0x43f   :  { %1019 = vmatmul.msk.f32.vlgmr.msra.gmra.mxu2 %vm39_vm0, %v738_v44 }
 0x445   :  { %v722_v47 = vpop.permute.xlu1 %721 }
 0x446   :  { %v736_v51 = vsel %vm351_vm3, %v734_v46, %v722_v47 }
 0x447   :  { %v739_v54 = vsel %vm737_vm12, %v736_v51, %v730_v49 }
 0x448   :  { %1020 = vmatmul.msk.f32.gmra.mxu2 %vm39_vm0, %v739_v54  ;;  %v875_v54 = vld [vmem:[%s1536_s5 + $0x10] sm:$0xff] }
 0x449   :  { %903 = vmatpush.msra.mxu0 %v875_v54 }
 0x4c2   :  { %v769_v60 = vpop.f32.mrf.mxu2 }
 0x4c3   :  { %v770_v56 = vadd.f32 %v1081_v55, %v769_v60  ;;  %v873_v60 = vld [vmem:[%s1536_s5] sm:$0xff] }
 0x4c5   :  { %v775_v48 = vadd.f32 %v770_v56, %v1226_v2  ;;  %v1084_v56 = vld [vmem:[%s1537_s6 + $0x9] ss:$0 sm:$0xff] }
 0x4c7   :  { %v779_v57 = vsel %vm39_vm0, %v775_v48, 0.0 }
 0x4c8   :  { %780 = vadd.xlane.f32.xlu1 %v779_v57 }
 0x4cb   :  { %v772_v58 = vpop.f32.mrf.mxu2 }
 0x4cc   :  { %v773_v59 = vadd.f32 %v1081_v55, %v772_v58  ;;  %v874_v55 = vld [vmem:[%s1536_s5 + $0x8] sm:$0xff] }
 0x4cd   :  { %904 = vmatpush.msra.mxu0 %v874_v55 }
 0x4ce   :  { %v776_v61 = vadd.f32 %v773_v59, %v1245_v8 }
 0x4cf   :  { %905 = vmatpush.msra.mxu0 %v873_v60 }
 0x4d0   :  { %v782_v62 = vsel %vm39_vm0, %v776_v61, 0.0 }
 0x4d1   :  { %783 = vadd.xlane.f32.xlu0 %v782_v62 }
 0x53b   :  { %v781_v2 = vpop.xlane.xlu1 %780 }
 0x53c   :  { %v792_v7 = vmul.f32 %v1453_v6, %v781_v2 }
 0x53e   :  { %v794_v9 = vsub.f32 %v775_v48, %v792_v7 }
 0x540   :  { %v796_v3 = vmul.f32 %v794_v9, %v794_v9 }
 0x542   :  { %v798_v8 = vsel %vm39_vm0, %v796_v3, 0.0 }
 0x543   :  { %799 = vadd.xlane.f32.xlu2 %v798_v8 }
 0x544   :  { %v784_v33 = vpop.xlane.xlu0 %783 }
 0x545   :  { %v793_v10 = vmul.f32 %v1453_v6, %v784_v33 }
 0x547   :  { %v795_v11 = vsub.f32 %v776_v61, %v793_v10 }
 0x549   :  { %v797_v53 = vmul.f32 %v795_v11, %v795_v11 }
 0x54b   :  { %v801_v13 = vsel %vm39_vm0, %v797_v53, 0.0 }
 0x54c   :  { %802 = vadd.xlane.f32.xlu1 %v801_v13 }
 0x5b6   :  { %v800_v20 = vpop.xlane.xlu2 %799 }
 0x5b7   :  { %v804_v21 = vmul.f32 %v800_v20, %v1453_v6 }
 0x5b9   :  { %v806_v16 = vadd.f32 1e-05, %v804_v21 }
 0x5bb   :  { %1124 = vrsqrt.f32 %v806_v16  ;;  %vm814_vm13 = vweird.f32 %v806_v16 }
 0x5bf   :  { %v803_v25 = vpop.xlane.xlu1 %802 }
 0x5c0   :  { %v805_v26 = vmul.f32 %v803_v25, %v1453_v6 }
 0x5c1   :  { %v1125_v28 = vpop.eup %1124 }
 0x5c2   :  { %v809_v12 = vmul.f32 %v1125_v28, %v806_v16  ;;  %v807_v30 = vadd.f32 1e-05, %v805_v26  ;;  %vm815_vm3 = vweird.f32 %v1125_v28 }
 0x5c3   :  { %vm816_vm14 = vmor %vm814_vm13, %vm815_vm3 }
 0x5c4   :  { %v810_v31 = vmul.f32 %v1125_v28, %v809_v12  ;;  %1126 = vrsqrt.f32 %v807_v30  ;;  %vm824_vm2 = vweird.f32 %v807_v30 }
 0x5c6   :  { %v811_v43 = vmul.f32 0.5, %v810_v31 }
 0x5c8   :  { %v812_v32 = vsub.f32 1.5, %v811_v43 }
 0x5ca   :  { %v1127_v34 = vpop.eup %1126  ;;  %v813_v35 = vmul.f32 %v1125_v28, %v812_v32 }
 0x5cb   :  { %v819_v38 = vmul.f32 %v1127_v34, %v807_v30  ;;  %vm825_vm15 = vweird.f32 %v1127_v34 }
 0x5cc   :  { %v817_v39 = vsel %vm816_vm14, %v1125_v28, %v813_v35  ;;  %vm826_vm4 = vmor %vm824_vm2, %vm825_vm15 }
 0x5cd   :  { %v828_v37 = vmul.f32 %v817_v39, %v794_v9  ;;  %v820_v18 = vmul.f32 %v1127_v34, %v819_v38 }
 0x5cf   :  { %v831_v41 = vmul.f32 %v1082_v36, %v828_v37  ;;  %v821_v42 = vmul.f32 0.5, %v820_v18 }
 0x5d1   :  { %v822_v44 = vsub.f32 1.5, %v821_v42  ;;  %v834_v29 = vadd.f32 %v1083_v40, %v831_v41 }
 0x5d3   :  { %v823_v45 = vmul.f32 %v1127_v34, %v822_v44  ;;  %1021 = vmatmul.msk.f32.vlgmr.msra.gmra.mxu3 %vm39_vm0, %v834_v29 }
 0x5d5   :  { %v827_v46 = vsel %vm826_vm4, %v1127_v34, %v823_v45  ;;  %v1087_v34 = vld [vmem:[%s1537_s6 + $0x8] ss:$0 sm:$0xff]  ;;  %s1171_s6 = smov 128  }
 0x5d6   :  { %v829_v47 = vmul.f32 %v827_v46, %v795_v11 }
 0x5d8   :  { %v832_v49 = vmul.f32 %v1082_v36, %v829_v47 }
 0x5da   :  { %v835_v51 = vadd.f32 %v1083_v40, %v832_v49 }
 0x5dc   :  { %1022 = vmatmul.msk.f32.gmra.mxu3 %vm39_vm0, %v835_v51 }
 0x656   :  { %v865_v48 = vpop.f32.mrf.mxu3 }
 0x657   :  { %v866_v57 = vadd.f32 %v1084_v56, %v865_v48 }
 0x659   :  { %v871_v58 = vmax.f32 %v866_v57, 0.0 }
 0x65b   :  { %1023 = vmatmul.msk.f32.vlgmr.msra.gmra.mxu0 %vm883_vm5, %v871_v58 }
 0x65f   :  { %v868_v59 = vpop.f32.mrf.mxu3 }
 0x660   :  { %v869_v61 = vadd.f32 %v1084_v56, %v868_v59 }
 0x662   :  { %v872_v62 = vmax.f32 %v869_v61, 0.0 }
 0x664   :  { %1024 = vmatmul.msk.f32.gmra.mxu0 %vm883_vm5, %v872_v62 }
 0x6d8   :  { %v907_v50 = vpop.f32.mrf.mxu0 }
 0x6d9   :  { %v908_v0 = vadd.f32 %v1085_v63, %v907_v50 }
 0x6db   :  { %v913_v1 = vadd.f32 %v908_v0, %v834_v29 }
 0x6dd   :  { %v917_v4 = vsel %vm39_vm0, %v913_v1, 0.0 }
 0x6de   :  { %918 = vadd.xlane.f32.xlu1 %v917_v4 }
 0x6e1   :  { %v910_v5 = vpop.f32.mrf.mxu0 }
 0x6e2   :  { %v911_v2 = vadd.f32 %v1085_v63, %v910_v5 }
 0x6e4   :  { %v914_v7 = vadd.f32 %v911_v2, %v835_v51 }
 0x6e6   :  { %v920_v9 = vsel %vm39_vm0, %v914_v7, 0.0 }
 0x6e7   :  { %921 = vadd.xlane.f32.xlu0 %v920_v9 }
 0x751   :  { %v919_v3 = vpop.xlane.xlu1 %918 }
 0x752   :  { %v923_v8 = vmul.f32 %v919_v3, %v1453_v6 }
 0x754   :  { %v925_v33 = vsub.f32 %v913_v1, %v923_v8 }
 0x756   :  { %v927_v10 = vmul.f32 %v925_v33, %v925_v33 }
 0x758   :  { %v929_v11 = vsel %vm39_vm0, %v927_v10, 0.0 }
 0x759   :  { %930 = vadd.xlane.f32.xlu1 %v929_v11 }
 0x75a   :  { %v922_v53 = vpop.xlane.xlu0 %921 }
 0x75b   :  { %v924_v13 = vmul.f32 %v922_v53, %v1453_v6 }
 0x75d   :  { %v926_v14 = vsub.f32 %v914_v7, %v924_v13 }
 0x75f   :  { %v928_v15 = vmul.f32 %v926_v14, %v926_v14 }
 0x761   :  { %v932_v17 = vsel %vm39_vm0, %v928_v15, 0.0 }
 0x762   :  { %933 = vadd.xlane.f32.xlu0 %v932_v17 }
 0x7cc   :  { %v931_v19 = vpop.xlane.xlu1 %930 }
 0x7cd   :  { %v935_v20 = vmul.f32 %v931_v19, %v1453_v6 }
 0x7cf   :  { %v937_v21 = vadd.f32 1e-05, %v935_v20 }
 0x7d1   :  { %1128 = vrsqrt.f32 %v937_v21  ;;  %vm945_vm7 = vweird.f32 %v937_v21 }
 0x7d5   :  { %v934_v16 = vpop.xlane.xlu0 %933 }
 0x7d6   :  { %v936_v22 = vmul.f32 %v934_v16, %v1453_v6 }
 0x7d7   :  { %v1129_v23 = vpop.eup %1128 }
 0x7d8   :  { %v940_v24 = vmul.f32 %v1129_v23, %v937_v21  ;;  %v938_v25 = vadd.f32 1e-05, %v936_v22  ;;  %vm946_vm6 = vweird.f32 %v1129_v23 }
 0x7d9   :  { %vm947_vm8 = vmor %vm945_vm7, %vm946_vm6 }
 0x7da   :  { %v941_v26 = vmul.f32 %v1129_v23, %v940_v24  ;;  %1130 = vrsqrt.f32 %v938_v25  ;;  %vm955_vm10 = vweird.f32 %v938_v25 }
 0x7dc   :  { %v942_v27 = vmul.f32 0.5, %v941_v26 }
 0x7de   :  { %v943_v28 = vsub.f32 1.5, %v942_v27 }
 0x7e0   :  { %v1131_v12 = vpop.eup %1130  ;;  %v944_v30 = vmul.f32 %v1129_v23, %v943_v28 }
 0x7e1   :  { %v950_v31 = vmul.f32 %v1131_v12, %v938_v25  ;;  %vm956_vm9 = vweird.f32 %v1131_v12 }
 0x7e2   :  { %v948_v43 = vsel %vm947_vm8, %v1129_v23, %v944_v30  ;;  %vm957_vm11 = vmor %vm955_vm10, %vm956_vm9 }
 0x7e3   :  { %v959_v32 = vmul.f32 %v948_v43, %v925_v33  ;;  %v951_v6 = vmul.f32 %v1131_v12, %v950_v31 }
 0x7e5   :  { %v962_v35 = vmul.f32 %v1086_v52, %v959_v32  ;;  %v952_v36 = vmul.f32 0.5, %v951_v6 }
 0x7e7   :  { %v953_v38 = vsub.f32 1.5, %v952_v36  ;;  %v965_v39 = vadd.f32 %v1087_v34, %v962_v35 }
 0x7e9   :  { %v954_v37 = vmul.f32 %v1131_v12, %v953_v38  ;;  %967 = vst.msk [vmem:[#allocation2] sm:$0xff] %vm39_vm0, %v965_v39 }
 0x7eb   :  { %v958_v18 = vsel %vm957_vm11, %v1131_v12, %v954_v37 }
 0x7ec   :  { %v960_v40 = vmul.f32 %v958_v18, %v926_v14 }
 0x7ee   :  { %v963_v41 = vmul.f32 %v1086_v52, %v960_v40 }
 0x7f0   :  { %v966_v42 = vadd.f32 %v1087_v34, %v963_v41 }
 0x7f2   :  { %968 = vst.msk [vmem:[#allocation2 + $0x8] sm:$0xff] %vm39_vm0, %v966_v42 }
 0x7f3   :  { %981 = dma.vmem_to_hbm [thread:$0]  %s974_s10, 256, %s976_s30, [#allocation3], %s1171_s6, %s1171_s6, %s1166_s12  }
 0x7f4   :  { %1156 = dma.done.wait [#allocation3], 256  }
 0x7f5   :  { %1157 = vsyncadd [#allocation3], 4294967040 }
 0x7f6   :  { %990 = vsyncpa [#allocation3], 1 }

</bundles_post_ra>
